<compile_context>
chip_gen: v7x
topology: tpu7x:2x2x1
jax: 0.10.0
libtpu: 0.0.40
codegen_flags: <defaults>
</compile_context>

<pallas_src>
import functools

import jax
import jax.numpy as jnp
from jax.experimental import pallas as pl
from jax.experimental.pallas import tpu as pltpu


# ---------------------------------------------------------------------------
# Kernel
# ---------------------------------------------------------------------------
def _patch_embed_kernel(*refs, use_norm: bool, eps: float):
    """One (TM, K) tile of flattened patches -> (TM, D) embeddings (+LayerNorm)."""
    if use_norm:
        xp_ref, w_ref, b_ref, g_ref, bt_ref, o_ref = refs
    else:
        xp_ref, w_ref, b_ref, o_ref = refs
        g_ref = bt_ref = None

    # Native-dtype operands: bf16 inputs take the fast bf16 MXU path; the
    # accumulator is always f32 via preferred_element_type.
    y = jnp.dot(xp_ref[...], w_ref[...],
                preferred_element_type=jnp.float32)        # (TM, D) f32
    y = y + b_ref[...]                                     # (1, D) f32 broadcast
    if use_norm:
        mean = jnp.mean(y, axis=-1, keepdims=True)
        var = jnp.mean(jnp.square(y - mean), axis=-1, keepdims=True)
        y = (y - mean) * jax.lax.rsqrt(var + eps)
        y = y * g_ref[...] + bt_ref[...]
    o_ref[...] = y.astype(o_ref.dtype)


# ---------------------------------------------------------------------------
# Tiling / VMEM accounting (layout-aware: 8-sublane x 128-lane padding)
# ---------------------------------------------------------------------------
def _round_up(x, m):
    return (x + m - 1) // m * m


def _padded_bytes(rows, cols, itemsize):
    """Physical VMEM footprint of a (rows, cols) block."""
    return _round_up(max(rows, 1), 8) * _round_up(max(cols, 1), 128) * itemsize


def _vmem_budget_and_cap():
    """(tile budget, physical-capacity estimate) in bytes, per generation."""
    cap = None
    try:
        cap = getattr(pltpu.get_tpu_info(), "vmem_capacity_bytes", None)
    except Exception:
        cap = None
    if not cap:
        cap = 64 * 1024 * 1024          # conservative: v7x per-core VMEM
    cap = int(cap)
    # ~0.7 of physical, capped at 64 MiB: v7x (64 MiB) -> ~45 MiB,
    # v5e/v6e (128 MiB) -> 64 MiB.  We always raise vmem_limit_bytes explicitly.
    budget = min(int(cap * 0.7), 64 * 1024 * 1024)
    return budget, cap


def _working_set_bytes(tm, K, D, in_b, out_b, w_b):
    """Padded, double-buffered working set for a (tm, K)->(tm, D) step."""
    return (2 * _padded_bytes(tm, K, in_b)       # input block, double-buffered
            + 2 * _padded_bytes(tm, D, out_b)    # output block, double-buffered
            + 3 * _padded_bytes(tm, D, 4)        # f32 dot result + LN temporaries
            + 2 * _padded_bytes(K, D, w_b)       # resident projection (2 bufs)
            + 6 * _padded_bytes(1, D, 4))        # bias / gamma / beta
    # (index maps for the weights/bias are constant -> DMA'd only once)


def _pick_tile_m(M, K, D, in_b, out_b, w_b, vmem_budget, min_grid_steps=8):
    """Largest row tile whose padded working set fits `vmem_budget`, capped so
    large problems still get >= min_grid_steps grid steps (v7x dual-TC balance)."""
    fixed = 2 * _padded_bytes(K, D, w_b) + 6 * _padded_bytes(1, D, 4)
    per_row = (2 * _round_up(K, 128) * in_b
               + 2 * _round_up(D, 128) * out_b
               + 3 * _round_up(D, 128) * 4)
    tm = max(16, (vmem_budget - fixed) // per_row)
    # Keep at least `min_grid_steps` steps for big M, but never shrink a tile
    # below 512 rows just for step count.
    step_cap = max(512, _round_up(pl.cdiv(M, min_grid_steps), 8))
    tm = min(tm, step_cap)
    if tm >= M:
        return M                               # single full-extent block
    return max(16, (tm // 16) * 16)            # 16-sublane granule (bf16-safe)


# ---------------------------------------------------------------------------
# Wrapper
# ---------------------------------------------------------------------------
def patch_embed_pallas(x, conv_w, conv_b, gamma=None, beta=None, *,
                       patch_size=4, eps=1e-5, tile_m=None):
    """x: (B, C, H, W); conv_w: (D, C, P, P); conv_b: (D,);
    gamma/beta: (D,) LayerNorm affine params or None.  Returns (B, H//P, W//P, D)."""
    B, C, H, W = x.shape
    P = patch_size
    assert H % P == 0 and W % P == 0, "H, W must be multiples of patch_size"
    D = conv_w.shape[0]
    Hp, Wp = H // P, W // P
    K = C * P * P
    M = B * Hp * Wp

    # Lane-dense (M, K) patch matrix; flattening order (c, ph, pw) matches the
    # OIHW conv-weight reshape below.  allow_input_fusion lets XLA fuse this
    # transpose/reshape into the kernel's input DMA instead of running it as a
    # separate HBM read+write pass.
    xp = (x.reshape(B, C, Hp, P, Wp, P)
            .transpose(0, 2, 4, 1, 3, 5)
            .reshape(M, K))
    w2 = conv_w.reshape(D, K).T                          # (K, D)
    b2 = conv_b.astype(jnp.float32).reshape(1, D)

    use_norm = gamma is not None
    out_dtype = x.dtype

    in_b = jnp.dtype(xp.dtype).itemsize
    w_b = jnp.dtype(w2.dtype).itemsize
    out_b = jnp.dtype(out_dtype).itemsize

    vmem_budget, vmem_cap = _vmem_budget_and_cap()
    if tile_m is None:
        TM = _pick_tile_m(M, K, D, in_b, out_b, w_b, vmem_budget)
    else:
        TM = M if tile_m >= M else max(8, (int(tile_m) // 8) * 8)
    grid = (pl.cdiv(M, TM),)                 # ragged last block handled by Pallas

    need = _working_set_bytes(TM, K, D, in_b, out_b, w_b)
    vmem_limit = int(min(vmem_cap, max(need + (8 << 20), 32 << 20)))

    in_specs = [
        pl.BlockSpec((TM, K), lambda i: (i, 0)),   # patch rows (tiled)
        pl.BlockSpec((K, D), lambda i: (0, 0)),    # projection (resident)
        pl.BlockSpec((1, D), lambda i: (0, 0)),    # bias
    ]
    args = [xp, w2, b2]
    if use_norm:
        in_specs += [pl.BlockSpec((1, D), lambda i: (0, 0)),   # LN gamma
                     pl.BlockSpec((1, D), lambda i: (0, 0))]   # LN beta
        args += [gamma.astype(jnp.float32).reshape(1, D),
                 beta.astype(jnp.float32).reshape(1, D)]

    kernel = functools.partial(_patch_embed_kernel, use_norm=use_norm, eps=eps)
    y = pl.pallas_call(
        kernel,
        out_shape=jax.ShapeDtypeStruct((M, D), out_dtype),
        grid=grid,
        in_specs=in_specs,
        out_specs=pl.BlockSpec((TM, D), lambda i: (i, 0)),
        compiler_params=pltpu.CompilerParams(
            dimension_semantics=("parallel",),                 # rows independent
            allow_input_fusion=[True] + [False] * (len(args) - 1),
            vmem_limit_bytes=vmem_limit),
    )(*args)

    return y.reshape(B, Hp, Wp, D)


# ---------------------------------------------------------------------------
# Pure-JAX reference (reproduces the PyTorch forward)
# ---------------------------------------------------------------------------
def patch_embed_reference(x, conv_w, conv_b, gamma=None, beta=None, *,
                          patch_size=4, eps=1e-5):
    P = patch_size
    y = jax.lax.conv_general_dilated(
        x, conv_w, window_strides=(P, P), padding="VALID",
        dimension_numbers=("NCHW", "OIHW", "NCHW"),
        precision=jax.lax.Precision.HIGHEST)
    y = y + conv_b[None, :, None, None]
    y = jnp.transpose(y, (0, 2, 3, 1))                   # (B, Hp, Wp, D)
    if gamma is not None:
        mean = jnp.mean(y, axis=-1, keepdims=True)
        var = jnp.mean(jnp.square(y - mean), axis=-1, keepdims=True)
        y = (y - mean) / jnp.sqrt(var + eps) * gamma + beta
    return y


if __name__ == "__main__":
    key = jax.random.PRNGKey(0)
    k = jax.random.split(key, 12)

    # Case 1: module defaults (in_chans=3, patch_size=4, embed_dim=96) + LayerNorm.
    B, C, H, W, P, D = 2, 3, 16, 16, 4, 96
    x = jax.random.normal(k[0], (B, C, H, W), dtype=jnp.float32)
    w = 0.2 * jax.random.normal(k[1], (D, C, P, P), dtype=jnp.float32)
    b = 0.1 * jax.random.normal(k[2], (D,), dtype=jnp.float32)
    gamma = 1.0 + 0.1 * jax.random.normal(k[3], (D,), dtype=jnp.float32)
    beta = 0.1 * jax.random.normal(k[4], (D,), dtype=jnp.float32)

    out = jax.block_until_ready(
        patch_embed_pallas(x, w, b, gamma, beta, patch_size=P))
    ref = patch_embed_reference(x, w, b, gamma, beta, patch_size=P)
    assert out.shape == (B, H // P, W // P, D)
    assert jnp.allclose(out, ref, atol=1e-4, rtol=1e-4), (
        f"case1 max abs diff = {jnp.max(jnp.abs(out - ref))}")

    # Case 2: norm_layer=None, lane-dense D=128, multi-step grid with a ragged
    # last block (M=128, TM=48 -> 3 steps, last block partially valid).
    B2, C2, H2, W2, P2, D2 = 2, 4, 32, 32, 4, 128
    x2 = jax.random.normal(k[5], (B2, C2, H2, W2), dtype=jnp.float32)
    w2 = 0.2 * jax.random.normal(k[6], (D2, C2, P2, P2), dtype=jnp.float32)
    b2 = 0.1 * jax.random.normal(k[7], (D2,), dtype=jnp.float32)

    out2 = jax.block_until_ready(
        patch_embed_pallas(x2, w2, b2, patch_size=P2, tile_m=48))
    ref2 = patch_embed_reference(x2, w2, b2, patch_size=P2)
    assert out2.shape == (B2, H2 // P2, W2 // P2, D2)
    assert jnp.allclose(out2, ref2, atol=1e-4, rtol=1e-4), (
        f"case2 max abs diff = {jnp.max(jnp.abs(out2 - ref2))}")

    # Case 3: bf16 input/weight streams (native bf16 MXU, f32 accumulation),
    # LayerNorm params in f32, multi-step grid.
    B3, C3, H3, W3, P3, D3 = 2, 3, 32, 32, 4, 96
    x3 = jax.random.normal(k[8], (B3, C3, H3, W3), dtype=jnp.bfloat16)
    w3 = (0.2 * jax.random.normal(k[9], (D3, C3, P3, P3),
                                  dtype=jnp.float32)).astype(jnp.bfloat16)
    b3 = 0.1 * jax.random.normal(k[10], (D3,), dtype=jnp.float32)
    g3 = 1.0 + 0.1 * jax.random.normal(k[11], (D3,), dtype=jnp.float32)
    bt3 = jnp.zeros((D3,), jnp.float32)

    out3 = jax.block_until_ready(
        patch_embed_pallas(x3, w3, b3, g3, bt3, patch_size=P3, tile_m=48))
    ref3 = patch_embed_reference(x3.astype(jnp.float32), w3.astype(jnp.float32),
                                 b3, g3, bt3, patch_size=P3)
    assert out3.shape == (B3, H3 // P3, W3 // P3, D3)
    assert jnp.allclose(out3.astype(jnp.float32), ref3, atol=1e-1, rtol=1e-1), (
        f"case3 max abs diff = {jnp.max(jnp.abs(out3.astype(jnp.float32) - ref3))}")

    print("KERNEL_OK")
</pallas_src>

<mosaic_0001>
module attributes {stable_mosaic.version = 11 : i64} {
  func.func @_patch_embed_kernel(%arg0: i32, %arg1: memref<32x48xf32, #tpu.memory_space<vmem>>, %arg2: memref<48x96xf32, #tpu.memory_space<vmem>>, %arg3: memref<1x96xf32, #tpu.memory_space<vmem>>, %arg4: memref<1x96xf32, #tpu.memory_space<vmem>>, %arg5: memref<1x96xf32, #tpu.memory_space<vmem>>, %arg6: memref<32x96xf32, #tpu.memory_space<vmem>>) attributes {dimension_semantics = [#tpu.dimension_semantics<parallel>], iteration_bounds = array<i64: 1>, scalar_prefetch = 0 : i64, scratch_operands = 0 : i64, tpu.core_type = #tpu.core_type<tc>, window_params = [{transform_indices = @transform_0, window_bounds = array<i64: 32, 48>}, {pipeline_mode = #tpu.pipeline_mode<synchronous>, transform_indices = @transform_1, window_bounds = array<i64: 48, 96>}, {pipeline_mode = #tpu.pipeline_mode<synchronous>, transform_indices = @transform_2, window_bounds = array<i64: 1, 96>}, {pipeline_mode = #tpu.pipeline_mode<synchronous>, transform_indices = @transform_3, window_bounds = array<i64: 1, 96>}, {pipeline_mode = #tpu.pipeline_mode<synchronous>, transform_indices = @transform_4, window_bounds = array<i64: 1, 96>}, {transform_indices = @transform_5, window_bounds = array<i64: 32, 96>}]} {
    %c0 = arith.constant 0 : index
    %c0_0 = arith.constant 0 : index
    %0 = vector.load %arg1[%c0, %c0_0] : memref<32x48xf32, #tpu.memory_space<vmem>>, vector<32x48xf32>
    %c0_1 = arith.constant 0 : index
    %c0_2 = arith.constant 0 : index
    %1 = vector.load %arg2[%c0_1, %c0_2] : memref<48x96xf32, #tpu.memory_space<vmem>>, vector<48x96xf32>
    %cst = arith.constant dense<0.000000e+00> : vector<32x96xf32>
    %2 = tpu.matmul %0, %1, %cst {dimension_numbers = #tpu.dot_dimension_numbers<[1], [0], [0], [1], [0, 0, 1, 1], [], []>} : vector<32x48xf32>, vector<48x96xf32>, vector<32x96xf32> -> vector<32x96xf32>
    %c0_3 = arith.constant 0 : index
    %c0_4 = arith.constant 0 : index
    %3 = vector.load %arg3[%c0_3, %c0_4] : memref<1x96xf32, #tpu.memory_space<vmem>>, vector<1x96xf32>
    %4 = vector.broadcast %3 : vector<1x96xf32> to vector<32x96xf32>
    %5 = arith.addf %2, %4 : vector<32x96xf32>
    %cst_5 = arith.constant dense<0.000000e+00> : vector<32xf32>
    %6 = vector.multi_reduction <add>, %5, %cst_5 [1] : vector<32x96xf32> to vector<32xf32>
    %7 = vector.shape_cast %6 : vector<32xf32> to vector<32x1xf32>
    %cst_6 = arith.constant 9.600000e+01 : f32
    %8 = vector.broadcast %cst_6 : f32 to vector<32x1xf32>
    %9 = arith.divf %7, %8 : vector<32x1xf32>
    %10 = vector.broadcast %9 : vector<32x1xf32> to vector<32x96xf32>
    %11 = arith.subf %5, %10 : vector<32x96xf32>
    %12 = arith.mulf %11, %11 : vector<32x96xf32>
    %cst_7 = arith.constant dense<0.000000e+00> : vector<32xf32>
    %13 = vector.multi_reduction <add>, %12, %cst_7 [1] : vector<32x96xf32> to vector<32xf32>
    %14 = vector.shape_cast %13 : vector<32xf32> to vector<32x1xf32>
    %cst_8 = arith.constant 9.600000e+01 : f32
    %15 = vector.broadcast %cst_8 : f32 to vector<32x1xf32>
    %16 = arith.divf %14, %15 : vector<32x1xf32>
    %17 = vector.broadcast %9 : vector<32x1xf32> to vector<32x96xf32>
    %18 = arith.subf %5, %17 : vector<32x96xf32>
    %cst_9 = arith.constant 9.99999974E-6 : f32
    %19 = vector.broadcast %cst_9 : f32 to vector<32x1xf32>
    %20 = arith.addf %16, %19 : vector<32x1xf32>
    %21 = math.rsqrt %20 : vector<32x1xf32>
    %22 = vector.broadcast %21 : vector<32x1xf32> to vector<32x96xf32>
    %23 = arith.mulf %18, %22 : vector<32x96xf32>
    %c0_10 = arith.constant 0 : index
    %c0_11 = arith.constant 0 : index
    %24 = vector.load %arg4[%c0_10, %c0_11] : memref<1x96xf32, #tpu.memory_space<vmem>>, vector<1x96xf32>
    %25 = vector.broadcast %24 : vector<1x96xf32> to vector<32x96xf32>
    %26 = arith.mulf %23, %25 : vector<32x96xf32>
    %c0_12 = arith.constant 0 : index
    %c0_13 = arith.constant 0 : index
    %27 = vector.load %arg5[%c0_12, %c0_13] : memref<1x96xf32, #tpu.memory_space<vmem>>, vector<1x96xf32>
    %28 = vector.broadcast %27 : vector<1x96xf32> to vector<32x96xf32>
    %29 = arith.addf %26, %28 : vector<32x96xf32>
    %c0_14 = arith.constant 0 : index
    %c0_15 = arith.constant 0 : index
    %30 = vector.load %arg6[%c0_14, %c0_15] : memref<32x96xf32, #tpu.memory_space<vmem>>, vector<32x96xf32>
    tpu.vector_store %arg6[%c0_14, %c0_15], %29 {strides = array<i32>} : memref<32x96xf32, #tpu.memory_space<vmem>>, vector<32x96xf32>,
    return
  }
  func.func @transform_0(%arg0: i32) -> (i32, i32) {
    %c0_i32 = arith.constant 0 : i32
    %c0_i32_0 = arith.constant 0 : i32
    return %arg0, %c0_i32 : i32, i32
  }
  func.func @transform_1(%arg0: i32) -> (i32, i32) {
    %c0_i32 = arith.constant 0 : i32
    %c0_i32_0 = arith.constant 0 : i32
    %c0_i32_1 = arith.constant 0 : i32
    return %c0_i32, %c0_i32_0 : i32, i32
  }
  func.func @transform_2(%arg0: i32) -> (i32, i32) {
    %c0_i32 = arith.constant 0 : i32
    %c0_i32_0 = arith.constant 0 : i32
    %c0_i32_1 = arith.constant 0 : i32
    return %c0_i32, %c0_i32_0 : i32, i32
  }
  func.func @transform_3(%arg0: i32) -> (i32, i32) {
    %c0_i32 = arith.constant 0 : i32
    %c0_i32_0 = arith.constant 0 : i32
    %c0_i32_1 = arith.constant 0 : i32
    return %c0_i32, %c0_i32_0 : i32, i32
  }
  func.func @transform_4(%arg0: i32) -> (i32, i32) {
    %c0_i32 = arith.constant 0 : i32
    %c0_i32_0 = arith.constant 0 : i32
    %c0_i32_1 = arith.constant 0 : i32
    return %c0_i32, %c0_i32_0 : i32, i32
  }
  func.func @transform_5(%arg0: i32) -> (i32, i32) {
    %c0_i32 = arith.constant 0 : i32
    %c0_i32_0 = arith.constant 0 : i32
    return %arg0, %c0_i32 : i32, i32
  }
}

</mosaic_0001>

<bundles_post_ra>
// kernel: tpu_custom_call.1
= control target key start
LH: loop header
LB: loop body
LE: loop exit
PB: predicated region body
PF: predicated region fallthrough
CT: control target
= control target key end

     0   :  { %10 = vsyncpa [#allocation3], 0  ;;  %s505_s0 = inlined_call_operand.hbm [shape: f32[32,48], index: 0, kind: input, shape index: {}]   ;;  %s506_s1 = inlined_call_operand.hbm [shape: f32[48,96], index: 1, kind: input, shape index: {}]   ;;  %s507_s2 = inlined_call_operand.vmem [shape: f32[1,96], index: 2, kind: input, shape index: {}]   ;;  %s508_s3 = inlined_call_operand.vmem [shape: f32[1,96], index: 3, kind: input, shape index: {}]   ;;  %s509_s4 = inlined_call_operand.vmem [shape: f32[1,96], index: 4, kind: input, shape index: {}]   ;;  %s510_s5 = inlined_call_operand.hbm [shape: f32[32,96], index: 5, kind: output, shape index: {}]  }
   0x1   :  { %11 = vsyncpa [#allocation6], 0 }
   0x2   :  { %12 = vsyncpa [#allocation4], 0  ;;  %s400_s18 = smov [#allocation2]   ;;  %s328_s22 = scalar_lea.hbm %s505_s0, 512 }
   0x3   :  { %s18_s19 = sshll.u32 %s400_s18, 4  ;;  %p329_p0 = scmp.ne.s32.totalorder %s505_s0, %s328_s22  ;;  %s19_s19 = int_to_ptr.vmem [resolvable:$true] %s18_s19 }
   0x4   :  { %p332_p1 = scmp.lt.u32.totalorder %s328_s22, %s505_s0 }
   0x6   :  { %p334_p2 = pnand %p332_p1, %p329_p0 }
   0x8   :  { %337 = shalt.err (!%p334_p2)
}
   0x9   :  { %s338_s27 = scalar_lea.vmem %s19_s19, 512  ;;  %p343_p4 = scmp.lt.s32.totalorder %s19_s19, %s19_s19 }
   0xa   :  { %p339_p3 = scmp.ne.s32.totalorder %s19_s19, %s338_s27  ;;  %p344_p5 = scmp.lt.s32.totalorder %s338_s27, %s338_s27 }
   0xc   :  { %p345_p6 = por %p344_p5, %p343_p4 }
   0xe   :  { %p346_p7 = pnand %p345_p6, %p339_p3 }
  0x10   :  { %349 = shalt.err (!%p346_p7)
}
  0x11   :  { %s401_s28 = smov 128   ;;  %s402_s29 = smov 8  }
  0x12   :  { %24 = dma.hbm_to_vmem [thread:$0]  %s505_s0, 512, %s19_s19, [#allocation3], %s401_s28, %s401_s28, %s402_s29  }
  0x13   :  { %s403_s7 = smov [#allocation5]   ;;  %s350_s11 = scalar_lea.hbm %s506_s1, 768 }
  0x14   :  { %s30_s8 = sshll.u32 %s403_s7, 4  ;;  %p351_p8 = scmp.ne.s32.totalorder %s506_s1, %s350_s11  ;;  %s31_s8 = int_to_ptr.vmem [resolvable:$true] %s30_s8 }
  0x15   :  { %p354_p9 = scmp.lt.u32.totalorder %s350_s11, %s506_s1 }
  0x17   :  { %p356_p10 = pnand %p354_p9, %p351_p8 }
  0x19   :  { %359 = shalt.err (!%p356_p10)
}
  0x1a   :  { %s360_s16 = scalar_lea.vmem %s31_s8, 768  ;;  %p365_p12 = scmp.lt.s32.totalorder %s31_s8, %s31_s8 }
  0x1b   :  { %p361_p11 = scmp.ne.s32.totalorder %s31_s8, %s360_s16  ;;  %p366_p13 = scmp.lt.s32.totalorder %s360_s16, %s360_s16 }
  0x1d   :  { %p367_p0 = por %p366_p13, %p365_p12 }
  0x1f   :  { %p368_p1 = pnand %p367_p0, %p361_p11 }
  0x21   :  { %371 = shalt.err (!%p368_p1)
}
  0x22   :  { %36 = dma.hbm_to_vmem [thread:$0]  %s506_s1, 768, %s31_s8, [#allocation6], %s401_s28, %s401_s28, %s402_s29  }
  0x23   :  { %394 = dma.done.wait [#allocation3], 512  }
  0x24   :  { %395 = vsyncadd [#allocation3], 4294966784 }
  0x25   :  { %396 = dma.done.wait [#allocation6], 768  }
  0x26   :  { %397 = vsyncadd [#allocation6], 4294966528  ;;  %v53_v0 = vld [vmem:[#allocation5] sm:$0xff]  ;;  %v54_v1 = vld [vmem:[#allocation5 + $0x8] sm:$0xff]  ;;  %vm66_vm0 = vcmask 392192   ;;  %vm164_vm1 = vcmask 785408  }
  0x27   :  { %v55_v2 = vld [vmem:[#allocation5 + $0x10] sm:$0xff]  ;;  %v297_v3 = vpack.c.bf16 %v54_v1, %v53_v0  ;;  %v56_v4 = vld [vmem:[#allocation5 + $0x18] sm:$0xff]  ;;  %v57_v6 = vld [vmem:[#allocation5 + $0x20] sm:$0xff] }
  0x28   :  { %v301_v5 = vpack.c.bf16 %v56_v4, %v55_v2  ;;  %v58_v7 = vld [vmem:[#allocation5 + $0x28] sm:$0xff]  ;;  %v49_v8 = vld [vmem:[#allocation2] sm:$0xff]  ;;  %v51_v9 = vld [vmem:[#allocation2 + $0x10] sm:$0xff] }
  0x29   :  { %298 = vmatprep.subr.bf16.mxu0 %v297_v3  ;;  %309 = vmatprep.subr.bf16.mxu1 %v297_v3  ;;  %v305_v10 = vpack.c.bf16 %v58_v7, %v57_v6  ;;  %v50_v11 = vld [vmem:[#allocation2 + $0x8] sm:$0xff]  ;;  %v52_v12 = vld [vmem:[#allocation2 + $0x18] sm:$0xff]  ;;  %v262_v13 = vld [vmem:[%s507_s2] ss:$0 sm:$0xff] }
  0x2a   :  { %300 = vmatpush3.bf16.msra.mxu0 %v297_v3  ;;  %312 = vmatpush3.bf16.msra.mxu1 %v297_v3  ;;  %v267_v59 = vld [vmem:[%s508_s3] ss:$0 sm:$0xff]  ;;  %s404_s3 = smov [#allocation7]  }
  0x2b   :  { %302 = vmatprep.subr.bf16.mxu0 %v301_v5  ;;  %310 = vmatprep.subr.bf16.mxu1 %v301_v5  ;;  %v268_v61 = vld [vmem:[%s509_s4] ss:$0 sm:$0xff]  ;;  %s249_s22 = sshll.u32 %s404_s3, 4  ;;  %s250_s22 = int_to_ptr.vmem [resolvable:$true] %s249_s22 }
  0x2c   :  { %291 = vmatprep.mubr.msk.f32.mxu0 %vm66_vm0, %v49_v8  ;;  %294 = vmatprep.mubr.msk.f32.mxu1 %vm66_vm0, %v51_v9  ;;  %s372_s4 = scalar_lea.vmem %s250_s22, 512  ;;  %p377_p3 = scmp.lt.s32.totalorder %s250_s22, %s250_s22 }
  0x2d   :  { %p373_p2 = scmp.ne.s32.totalorder %s250_s22, %s372_s4  ;;  %p378_p4 = scmp.lt.s32.totalorder %s372_s4, %s372_s4 }
  0x2e   :  { %304 = vmatpush3.bf16.msra.mxu0 %v301_v5  ;;  %313 = vmatpush3.bf16.msra.mxu1 %v301_v5 }
  0x2f   :  { %306 = vmatprep.subr.bf16.mxu0 %v305_v10  ;;  %311 = vmatprep.subr.bf16.mxu1 %v305_v10  ;;  %p379_p5 = por %p378_p4, %p377_p3 }
  0x31   :  { %p380_p6 = pnand %p379_p5, %p373_p2 }
  0x32   :  { %308 = vmatpush3.bf16.msra.mxu0 %v305_v10  ;;  %314 = vmatpush3.bf16.msra.mxu1 %v305_v10 }
  0x35   :  { %292 = vmatmul.mubr.msk.f32.vlgmr.msra.gmra.mrb[0].mxu0 %vm66_vm0, %v50_v11  ;;  %295 = vmatmul.mubr.msk.f32.vlgmr.msra.gmra.mrb[0].mxu1 %vm66_vm0, %v52_v12 }
 0x108   :  { %v293_v14 = vpop.f32.mrb[0].mxu0  ;;  %v296_v15 = vpop.f32.mrb[0].mxu1 }
 0x109   :  { %v145_v16 = vpop.f32.mrb[1].mxu0  ;;  %v155_v17 = vpop.f32.mrb[1].mxu1  ;;  %v161_v18 = vadd.f32 %v296_v15, %v262_v13  ;;  %v151_v21 = vadd.f32 %v293_v14, %v262_v13 }
 0x10a   :  { %v146_v19 = vadd.f32 %v262_v13, %v145_v16  ;;  %v156_v20 = vadd.f32 %v262_v13, %v155_v17 }
 0x10b   :  { %v174_v24 = vsel %vm164_vm1, %v161_v18, 0.0  ;;  %v168_v25 = vsel %vm164_vm1, %v151_v21, 0.0 }
 0x10c   :  { %v171_v22 = vsel %vm164_vm1, %v156_v20, 0.0  ;;  %v165_v23 = vsel %vm164_vm1, %v146_v19, 0.0 }
 0x10d   :  { %172 = vadd.xlane.f32.xlu1 %v171_v22  ;;  %166 = vadd.xlane.f32.xlu0 %v165_v23 }
 0x111   :  { %175 = vadd.xlane.f32.xlu1 %v174_v24  ;;  %169 = vadd.xlane.f32.xlu0 %v168_v25 }
 0x19a   :  { %v173_v26 = vpop.xlane.xlu1 %172  ;;  %v167_v27 = vpop.xlane.xlu0 %166 }
 0x19b   :  { %v180_v28 = vmul.f32 0.010416667, %v173_v26  ;;  %v178_v29 = vmul.f32 0.010416667, %v167_v27 }
 0x19d   :  { %v184_v30 = vsub.f32 %v156_v20, %v180_v28  ;;  %v182_v31 = vsub.f32 %v146_v19, %v178_v29 }
 0x19e   :  { %v176_v32 = vpop.xlane.xlu1 %175  ;;  %v170_v33 = vpop.xlane.xlu0 %169 }
 0x19f   :  { %v181_v34 = vmul.f32 0.010416667, %v176_v32  ;;  %v179_v35 = vmul.f32 0.010416667, %v170_v33  ;;  %v186_v36 = vmul.f32 %v182_v31, %v182_v31  ;;  %v188_v40 = vmul.f32 %v184_v30, %v184_v30 }
 0x1a1   :  { %v185_v37 = vsub.f32 %v161_v18, %v181_v34  ;;  %v183_v38 = vsub.f32 %v151_v21, %v179_v35  ;;  %v190_v39 = vsel %vm164_vm1, %v186_v36, 0.0  ;;  %v196_v42 = vsel %vm164_vm1, %v188_v40, 0.0 }
 0x1a2   :  { %191 = vadd.xlane.f32.xlu0 %v190_v39 }
 0x1a3   :  { %v187_v41 = vmul.f32 %v183_v38, %v183_v38  ;;  %v189_v44 = vmul.f32 %v185_v37, %v185_v37 }
 0x1a5   :  { %v193_v43 = vsel %vm164_vm1, %v187_v41, 0.0  ;;  %v199_v45 = vsel %vm164_vm1, %v189_v44, 0.0 }
 0x1a6   :  { %197 = vadd.xlane.f32.xlu0 %v196_v42  ;;  %194 = vadd.xlane.f32.xlu1 %v193_v43 }
 0x1aa   :  { %200 = vadd.xlane.f32.xlu1 %v199_v45 }
 0x22f   :  { %v192_v46 = vpop.xlane.xlu0 %191 }
 0x230   :  { %v202_v47 = vmul.f32 0.010416667, %v192_v46 }
 0x232   :  { %v206_v48 = vadd.f32 1e-05, %v202_v47 }
 0x233   :  { %v195_v49 = vpop.xlane.xlu1 %194  ;;  %v198_v50 = vpop.xlane.xlu0 %197 }
 0x234   :  { %320 = vrsqrt.f32 %v206_v48  ;;  %v203_v51 = vmul.f32 0.010416667, %v195_v49  ;;  %v204_v52 = vmul.f32 0.010416667, %v198_v50 }
 0x236   :  { %v207_v53 = vadd.f32 1e-05, %v203_v51  ;;  %v208_v54 = vadd.f32 1e-05, %v204_v52 }
 0x237   :  { %v201_v55 = vpop.xlane.xlu1 %200 }
 0x238   :  { %322 = vrsqrt.f32 %v207_v53  ;;  %v205_v56 = vmul.f32 0.010416667, %v201_v55 }
 0x239   :  { %324 = vrsqrt.f32 %v208_v54 }
 0x23a   :  { %v209_v57 = vadd.f32 1e-05, %v205_v56 }
 0x23c   :  { %326 = vrsqrt.f32 %v209_v57 }
 0x23e   :  { %v321_v58 = vpop.eup %320 }
 0x23f   :  { %v214_v60 = vmul.f32 %v321_v58, %v182_v31 }
 0x241   :  { %v225_v62 = vmul.f32 %v267_v59, %v214_v60 }
 0x242   :  { %v323_v63 = vpop.eup %322 }
 0x243   :  { %v325_v0 = vpop.eup %324  ;;  %v215_v1 = vmul.f32 %v323_v63, %v183_v38  ;;  %v236_v2 = vadd.f32 %v268_v61, %v225_v62 }
 0x244   :  { %v216_v3 = vmul.f32 %v325_v0, %v184_v30 }
 0x245   :  { %v226_v4 = vmul.f32 %v267_v59, %v215_v1  ;;  %240 = vst.msk [vmem:[#allocation7] sm:$0xff] %vm164_vm1, %v236_v2 }
 0x246   :  { %v327_v5 = vpop.eup %326  ;;  %v227_v6 = vmul.f32 %v267_v59, %v216_v3 }
 0x247   :  { %v217_v7 = vmul.f32 %v327_v5, %v185_v37  ;;  %v237_v8 = vadd.f32 %v268_v61, %v226_v4 }
 0x248   :  { %v238_v9 = vadd.f32 %v268_v61, %v227_v6 }
 0x249   :  { %v228_v10 = vmul.f32 %v267_v59, %v217_v7  ;;  %241 = vst.msk [vmem:[#allocation7 + $0x8] sm:$0xff] %vm164_vm1, %v237_v8 }
 0x24a   :  { %242 = vst.msk [vmem:[#allocation7 + $0x10] sm:$0xff] %vm164_vm1, %v238_v9 }
 0x24b   :  { %v239_v11 = vadd.f32 %v268_v61, %v228_v10 }
 0x24d   :  { %243 = vst.msk [vmem:[#allocation7 + $0x18] sm:$0xff] %vm164_vm1, %v239_v11 }
 0x24e   :  { %383 = shalt.err (!%p380_p6)
}
 0x24f   :  { %s384_s25 = scalar_lea.hbm %s510_s5, 512 }
 0x250   :  { %p385_p7 = scmp.ne.s32.totalorder %s510_s5, %s384_s25  ;;  %p388_p8 = scmp.lt.u32.totalorder %s384_s25, %s510_s5 }
 0x252   :  { %p390_p9 = pnand %p388_p8, %p385_p7 }
 0x254   :  { %393 = shalt.err (!%p390_p9)
}
 0x255   :  { %255 = dma.vmem_to_hbm [thread:$0]  %s250_s22, 512, %s510_s5, [#allocation4], %s401_s28, %s401_s28, %s402_s29  }
 0x256   :  { %398 = dma.done.wait [#allocation4], 512  }
 0x257   :  { %399 = vsyncadd [#allocation4], 4294966784 }
 0x258   :  { %259 = vsyncpa [#allocation3], 1 }
 0x259   :  { %260 = vsyncpa [#allocation6], 1 }
 0x25a   :  { %261 = vsyncpa [#allocation4], 1 }

</bundles_post_ra>
